<compile_context>
chip_gen: v7x
topology: tpu7x:2x2x1
jax: 0.10.0
libtpu: 0.0.40
codegen_flags: <defaults>
</compile_context>

<pallas_src>
import functools

import jax
import jax.numpy as jnp
from jax import lax
from jax.experimental import pallas as pl
from jax.experimental.pallas import tpu as pltpu

_LANE = 128


def _device_kind():
    try:
        return jax.devices()[0].device_kind.lower()
    except Exception:  # pragma: no cover - defensive
        return ""


def _default_num_cores():
    # v7x has 2 TensorCores per chip; v5e/v6e have 1.  A wrong guess only adds
    # a size-1 (or sequentially-executed) leading grid dim — always correct.
    return 2 if "v7" in _device_kind() else 1


def _l1_compute_dtype(dtype):
    # v6e/v7x VALUs run bf16 at 2x packed throughput; v5e has no bf16 VALU.
    if dtype == jnp.bfloat16 and "v5" not in _device_kind():
        return jnp.bfloat16
    return jnp.float32


def _choose_tile(n, d_layer, itemsize, kind):
    """Pick the D-axis tile (multiple of 128).

    Large tiles amortize the ~0.35us per-grid-step overhead; for small-N
    FedGen shapes the l2/cosine path collapses to a single grid step.
    """
    d_lane = pl.cdiv(d_layer, _LANE) * _LANE
    if kind == "l1":
        # VALU-bound path; keep the f32-cast streamed tile ~2 MiB and the
        # static per-128-chunk unroll modest.
        cap = min(8192, (2 << 20) // max(n * 4, 1))
    else:
        # MXU/DMA path: single grid step whenever the whole (N, D) slab is a
        # few MiB, otherwise stream wide (<=32768-lane) tiles.
        if n * d_lane * itemsize <= (8 << 20):
            cap = d_lane
        else:
            cap = min(32768, (8 << 20) // max(n * itemsize, 1))
    cap = max(_LANE, (cap // _LANE) * _LANE)
    return min(cap, d_lane)


def _pairwise_accum_kernel(layer_ref, acc_ref, *, kind, d_layer, tile,
                           tiles_per_core, need_mask, lane_acc, l1_dtype):
    c = pl.program_id(0)          # TensorCore share of the D reduction
    t = pl.program_id(1)          # D-tile index within this core's share

    @pl.when(t == 0)
    def _init():
        acc_ref[...] = jnp.zeros_like(acc_ref)

    x = layer_ref[...]                                    # (n, tile), native dtype
    if need_mask:
        # The last D tile may run past d_layer (no wrapper-side padding):
        # zero the out-of-range lanes so they contribute nothing.
        col = lax.broadcasted_iota(jnp.int32, x.shape, 1)
        offset = (c * tiles_per_core + t) * tile
        x = jnp.where(col + offset < d_layer, x, jnp.zeros_like(x))

    if kind == "gram":
        # l2 / cosine: Gram matrix on the MXU (NT contraction, no transposed
        # copy), f32 accumulation.  All epilogue math happens in JAX.
        acc_ref[...] += lax.dot_general(
            x, x, dimension_numbers=(((1,), (1,)), ((), ())),
            preferred_element_type=jnp.float32)
    else:  # l1: pure-VALU |x[j] - x[i]| accumulation, 128 lanes at a time.
        xe = x.astype(l1_dtype)
        acc = acc_ref[...]
        for k in range(tile // _LANE):                    # static unroll
            chunk = xe[:, k * _LANE:(k + 1) * _LANE]      # (n, 128)
            slab = jnp.abs(chunk[None, :, :] - chunk[:, None, :]).astype(jnp.float32)
            if lane_acc:
                acc = acc + slab                          # (n, n, 128): XLU reduce deferred
            else:
                acc = acc + jnp.sum(slab, axis=-1)        # large-n fallback: (n, n)
        acc_ref[...] = acc


@functools.partial(jax.jit, static_argnames=("metric", "tile_d", "num_cores"))
def diversity_loss(noises, layer, metric="l2", *, tile_d=None, num_cores=None):
    """Mirrors DiversityLoss(metric).forward(noises, layer)."""
    if metric not in ("l1", "l2", "cosine"):
        raise ValueError(metric)
    if layer.ndim > 2:
        layer = layer.reshape(layer.shape[0], -1)         # PyTorch .view(N, -1)
    n, d_layer = layer.shape
    itemsize = jnp.dtype(layer.dtype).itemsize
    kind = "l1" if metric == "l1" else "gram"

    # ---- D-axis tile (multiple of 128); the layer tensor is NOT padded ----
    if tile_d is None:
        tile = _choose_tile(n, d_layer, itemsize, kind)
    else:
        assert tile_d % _LANE == 0, "tile_d must be a multiple of 128"
        tile = min(tile_d, pl.cdiv(d_layer, _LANE) * _LANE)
    nvb = pl.cdiv(d_layer, tile)                          # D tiles covering d_layer

    # ---- optional split of the D reduction across TensorCores (v7x) ----
    if num_cores is None:
        num_cores = _default_num_cores()
    num_cores = max(1, min(int(num_cores), nvb))
    if nvb % num_cores != 0:
        num_cores = 1                                     # keep the grid un-padded
    tiles_per_core = nvb // num_cores

    need_mask = (d_layer % tile) != 0
    # Lane-shaped l1 accumulator only while it stays small (n <~ 90); beyond
    # that fall back to an (n, n) accumulator with a per-step lane reduce.
    lane_acc = (kind == "l1") and (n * n * _LANE * 4 <= (4 << 20))
    l1_dtype = _l1_compute_dtype(layer.dtype)

    if kind == "l1" and lane_acc:
        acc_shape = (num_cores, n, n, _LANE)
        out_spec = pl.BlockSpec((None, n, n, _LANE), lambda c, t: (c, 0, 0, 0))
    else:
        acc_shape = (num_cores, n, n)
        out_spec = pl.BlockSpec((None, n, n), lambda c, t: (c, 0, 0))

    # ---- VMEM budget (<= 32 MiB so the same sizing compiles on v7x) ----
    acc_bytes = n * n * 4 * (_LANE if (kind == "l1" and lane_acc) else 1)
    tmp = (n * tile * 4 + 3 * n * n * _LANE * 4) if kind == "l1" else 2 * n * n * 4
    est = 3 * n * tile * itemsize + 2 * acc_bytes + tmp + (2 << 20)
    vmem_limit = int(min(max(est, 16 << 20), 32 << 20))

    kernel = functools.partial(
        _pairwise_accum_kernel, kind=kind, d_layer=d_layer, tile=tile,
        tiles_per_core=tiles_per_core, need_mask=need_mask,
        lane_acc=lane_acc, l1_dtype=l1_dtype)

    acc = pl.pallas_call(
        kernel,
        out_shape=jax.ShapeDtypeStruct(acc_shape, jnp.float32),
        grid_spec=pltpu.PrefetchScalarGridSpec(
            num_scalar_prefetch=0,
            grid=(num_cores, tiles_per_core),
            in_specs=[pl.BlockSpec((n, tile),
                                   lambda c, t: (0, c * tiles_per_core + t))],
            out_specs=out_spec),
        compiler_params=pltpu.CompilerParams(
            dimension_semantics=("parallel", "arbitrary"),
            vmem_limit_bytes=vmem_limit),
    )(layer)

    # ---- epilogue in plain JAX (tiny (n, n) work) ----
    if kind == "l1":
        s = acc.sum(axis=(0, 3)) if lane_acc else acc.sum(axis=0)
        layer_dist = s / d_layer
    else:
        g = acc.sum(axis=0)                               # full f32 Gram
        sq = jnp.diagonal(g)                              # row sum-of-squares
        if metric == "l2":
            # NOTE: Gram-form L2 loses precision for near-duplicate rows;
            # clamped at 0 (fine at ~1e-4 tolerance for typical inputs).
            layer_dist = jnp.maximum(sq[:, None] + sq[None, :] - 2.0 * g, 0.0) / d_layer
        else:  # cosine — reference clamps ||xi||*||xj|| at 1e-8
            norms = jnp.sqrt(jnp.maximum(sq, 0.0))
            den = jnp.maximum(norms[:, None] * norms[None, :], 1e-8)
            layer_dist = 1.0 - g / den

    z = noises.astype(jnp.float32)
    noise_dist = jnp.mean((z[None, :, :] - z[:, None, :]) ** 2, axis=2)
    return jnp.exp(jnp.mean(-noise_dist * layer_dist))


def _reference(noises, layer, metric):
    """Pure-JAX reference with the exact PyTorch broadcasting semantics."""
    if layer.ndim > 2:
        layer = layer.reshape(layer.shape[0], -1)

    def pairwise(t, how):
        t1 = t[None, :, :]            # tensor.expand((n, n, d)) -> [i, j] = t[j]
        t2 = t[:, None, :]            # tensor.unsqueeze(1)      -> [i, j] = t[i]
        if how == "l1":
            return jnp.mean(jnp.abs(t1 - t2), axis=2)
        if how == "l2":
            return jnp.mean((t1 - t2) ** 2, axis=2)
        if how == "cosine":
            num = jnp.sum(t1 * t2, axis=2)
            den = jnp.maximum(
                jnp.linalg.norm(t1, axis=2) * jnp.linalg.norm(t2, axis=2), 1e-8)
            return 1.0 - num / den
        raise ValueError(how)

    layer_dist = pairwise(layer, metric)
    noise_dist = pairwise(noises, "l2")
    return jnp.exp(jnp.mean(-noise_dist * layer_dist))


if __name__ == "__main__":
    key = jax.random.PRNGKey(0)
    k1, k2, k3 = jax.random.split(key, 3)

    # layer: generator feature map NCHW (flattened in wrapper); noises: (N, noise_dim)
    layer = jax.random.normal(k1, (4, 4, 8, 8), dtype=jnp.float32)        # N=4, D=256
    noises = jax.random.normal(k2, (4, 32), dtype=jnp.float32)            # N=4, Dn=32
    layer_ragged = jax.random.normal(k3, (4, 3, 7, 7), dtype=jnp.float32)  # N=4, D=147

    def check(out, ref, tag):
        assert jnp.allclose(out, ref, rtol=1e-4, atol=1e-5), (tag, out, ref)

    # single-step path (default tiles), all three metrics
    for metric in ("l2", "l1", "cosine"):
        out = jax.block_until_ready(diversity_loss(noises, layer, metric=metric))
        check(out, _reference(noises, layer, metric), metric)

    # multi-step D reduction (forces grid accumulation across two tiles)
    out = jax.block_until_ready(diversity_loss(noises, layer, metric="l2", tile_d=128))
    check(out, _reference(noises, layer, "l2"), "l2/tiled")

    # ragged feature dim: no wrapper-side pad, in-kernel tail masking
    for metric in ("l2", "l1"):
        out = jax.block_until_ready(diversity_loss(noises, layer_ragged, metric=metric))
        check(out, _reference(noises, layer_ragged, metric), metric + "/ragged")

    # forced two-core split of the D reduction (v7x-style); runs correctly
    # (sequentially) on single-TensorCore chips too
    out = jax.block_until_ready(
        diversity_loss(noises, layer, metric="l2", tile_d=128, num_cores=2))
    check(out, _reference(noises, layer, "l2"), "l2/2core")
    out = jax.block_until_ready(
        diversity_loss(noises, layer_ragged, metric="l2", tile_d=128, num_cores=2))
    check(out, _reference(noises, layer_ragged, "l2"), "l2/2core/ragged")

    print("KERNEL_OK")
</pallas_src>

<mosaic_0001>
module attributes {stable_mosaic.version = 11 : i64} {
  func.func @_pairwise_accum_kernel(%arg0: i32, %arg1: i32, %arg2: memref<4x256xf32, #tpu.memory_space<vmem>>, %arg3: memref<1x4x4xf32, #tpu.memory_space<vmem>>) attributes {dimension_semantics = [#tpu.dimension_semantics<parallel>, #tpu.dimension_semantics<arbitrary>], iteration_bounds = array<i64: 1, 1>, scalar_prefetch = 0 : i64, scratch_operands = 0 : i64, tpu.core_type = #tpu.core_type<tc>, window_params = [{transform_indices = @transform_0, window_bounds = array<i64: 4, 256>}, {transform_indices = @transform_1, window_bounds = array<i64: 1, 4, 4>}]} {
    %c0_i32 = arith.constant 0 : i32
    %0 = arith.cmpi eq, %arg1, %c0_i32 : i32
    %1 = arith.extui %0 : i1 to i32
    %c0_i32_0 = arith.constant 0 : i32
    %2 = arith.cmpi ne, %1, %c0_i32_0 : i32
    scf.if %2 {
      %cst_8 = arith.constant 0.000000e+00 : f32
      %11 = vector.broadcast %cst_8 : f32 to vector<4x4xf32>
      %c0_9 = arith.constant 0 : index
      %c0_10 = arith.constant 0 : index
      %c0_11 = arith.constant 0 : index
      %12 = vector.load %arg3[%c0_9, %c0_10, %c0_11] : memref<1x4x4xf32, #tpu.memory_space<vmem>>, vector<1x4x4xf32>
      %13 = vector.shape_cast %12 : vector<1x4x4xf32> to vector<4x4xf32>
      %14 = vector.shape_cast %11 : vector<4x4xf32> to vector<1x4x4xf32>
      tpu.vector_store %arg3[%c0_9, %c0_10, %c0_11], %14 {strides = array<i32>} : memref<1x4x4xf32, #tpu.memory_space<vmem>>, vector<1x4x4xf32>,
    } else {
    }
    %c0 = arith.constant 0 : index
    %c0_1 = arith.constant 0 : index
    %3 = vector.load %arg2[%c0, %c0_1] : memref<4x256xf32, #tpu.memory_space<vmem>>, vector<4x256xf32>
    %c0_2 = arith.constant 0 : index
    %c0_3 = arith.constant 0 : index
    %c0_4 = arith.constant 0 : index
    %4 = vector.load %arg3[%c0_2, %c0_3, %c0_4] : memref<1x4x4xf32, #tpu.memory_space<vmem>>, vector<1x4x4xf32>
    %5 = vector.shape_cast %4 : vector<1x4x4xf32> to vector<4x4xf32>
    %cst = arith.constant dense<0.000000e+00> : vector<4x4xf32>
    %6 = tpu.matmul %3, %3, %cst {dimension_numbers = #tpu.dot_dimension_numbers<[1], [1], [0], [0], [0, 0, 1, 0], [], []>} : vector<4x256xf32>, vector<4x256xf32>, vector<4x4xf32> -> vector<4x4xf32>
    %7 = arith.addf %5, %6 : vector<4x4xf32>
    %c0_5 = arith.constant 0 : index
    %c0_6 = arith.constant 0 : index
    %c0_7 = arith.constant 0 : index
    %8 = vector.load %arg3[%c0_5, %c0_6, %c0_7] : memref<1x4x4xf32, #tpu.memory_space<vmem>>, vector<1x4x4xf32>
    %9 = vector.shape_cast %8 : vector<1x4x4xf32> to vector<4x4xf32>
    %10 = vector.shape_cast %7 : vector<4x4xf32> to vector<1x4x4xf32>
    tpu.vector_store %arg3[%c0_5, %c0_6, %c0_7], %10 {strides = array<i32>} : memref<1x4x4xf32, #tpu.memory_space<vmem>>, vector<1x4x4xf32>,
    return
  }
  func.func @transform_0(%arg0: i32, %arg1: i32) -> (i32, i32) {
    %c1_i32 = arith.constant 1 : i32
    %0 = arith.muli %arg0, %c1_i32 : i32
    %1 = arith.addi %0, %arg1 : i32
    %c0_i32 = arith.constant 0 : i32
    %c0_i32_0 = arith.constant 0 : i32
    return %c0_i32, %1 : i32, i32
  }
  func.func @transform_1(%arg0: i32, %arg1: i32) -> (i32, i32, i32) {
    %c0_i32 = arith.constant 0 : i32
    %c0_i32_0 = arith.constant 0 : i32
    %c0_i32_1 = arith.constant 0 : i32
    return %arg0, %c0_i32, %c0_i32_0 : i32, i32, i32
  }
}

</mosaic_0001>

<bundles_post_ra>
// kernel: diversity_loss.1
= control target key start
LH: loop header
LB: loop body
LE: loop exit
PB: predicated region body
PF: predicated region fallthrough
CT: control target
= control target key end

     0   :  { %vm34_vm0 = vcmask 27648   ;;  %v126_v1 = vmov 0.0   ;;  %s149_s0 = inlined_call_operand.vmem [shape: f32[4,256], index: 0, kind: input, shape index: {}]   ;;  %s150_s1 = inlined_call_operand.vmem [shape: f32[1,4,4], index: 1, kind: output, shape index: {}]  }
   0x1   :  { %v36_v0 = vld [vmem:[%s149_s0] sm:$0xff]  ;;  %35 = vst.msk [vmem:[%s150_s1] sm:$0xf] %vm34_vm0, %v126_v1 }
   0x2   :  { %v39_v2 = vcombine.high %v36_v0, %v36_v0 }
   0x4   :  { %41 = vmatprep.subr.mxu0 %v39_v2  ;;  %105 = vmatprep.mubr.f32.mxu0 %v39_v2 }
   0x5   :  { %42 = vmatpush1.xpose.msra.mxu0 %v36_v0 }
   0x8   :  { %106 = vmatmul.mubr.f32.vlgmr.msra.gmra.mrb[0].mxu0 %v36_v0  ;;  %v37_v3 = vld [vmem:[%s150_s1] sm:$0xf] }
  0xdb   :  { %v107_v4 = vpop.f32.mrb[0].mxu0 }
  0xdc   :  { %v111_v5 = vadd.f32 %v107_v4, %v37_v3  ;;  %v109_v6 = vpop.f32.mrb[1].mxu0 }
  0xde   :  { %113 = vst.msk [vmem:[%s150_s1] sm:$0xf] %vm34_vm0, %v111_v5 }

</bundles_post_ra>
